<compile_context>
chip_gen: v5e
topology: v5e:2x2
jax: 0.10.0
libtpu: 0.0.40
codegen_flags: <defaults>
</compile_context>

<pallas_src>
import functools

import jax
import jax.numpy as jnp
from jax.experimental import pallas as pl
from jax.experimental.pallas import tpu as pltpu

BN_EPS = 1e-5


# --------------------------------------------------------------------------- #
# Kernels
# --------------------------------------------------------------------------- #
def _point_mlp_kernel(tile_n, n_true, n_pad,
                      x_ref, w1_ref, t1_ref, w2_ref, t2_ref, w3_ref, t3_ref,
                      pool_ref, acc_ref):
    """One point tile: conv1/2 (+folded BN, ReLU), raw conv3, running max."""
    t = pl.program_id(1)
    last = pl.num_programs(1) - 1

    @pl.when(t == 0)
    def _init():
        # -inf is the identity for max over the raw (pre-bias/ReLU) conv3 output.
        acc_ref[...] = jnp.full_like(acc_ref, -jnp.inf)

    x = x_ref[...].astype(jnp.bfloat16)                         # (3, TILE_N)

    # conv1 (1x1) + folded bn1 + relu -> (TILE_N, 64); contract the 3-axis.
    h = jax.lax.dot_general(x, w1_ref[...],
                            dimension_numbers=(((0,), (0,)), ((), ())),
                            preferred_element_type=jnp.float32)
    h = jnp.maximum(h + t1_ref[...], 0.0)
    # conv2 (1x1) + folded bn2 + relu -> (TILE_N, 128)
    h = jnp.dot(h.astype(jnp.bfloat16), w2_ref[...],
                preferred_element_type=jnp.float32)
    h = jnp.maximum(h + t2_ref[...], 0.0)
    # conv3 (1x1): raw matmul only -> (TILE_N, 256).  Its bias + ReLU commute
    # with the max and are applied once on the pooled vector (see _finalize).
    h3 = jnp.dot(h.astype(jnp.bfloat16), w3_ref[...],
                 preferred_element_type=jnp.float32)

    def _accumulate(v):
        # Fold the point axis into groups of 8 sublanes: per-tile update is a
        # pure full-vreg VPU max into the (8, 256) scratch (no cross-sublane
        # work until the final tile).
        g = v.reshape(tile_n // 8, 8, v.shape[-1])
        acc_ref[...] = jnp.maximum(acc_ref[...], jnp.max(g, axis=0))

    if n_pad == n_true:
        _accumulate(h3)
    else:
        # Only the last tile contains padded points: keep the select off the
        # hot path.
        @pl.when(t != last)
        def _hot():
            _accumulate(h3)

        @pl.when(t == last)
        def _masked():
            idx = t * tile_n + jax.lax.broadcasted_iota(
                jnp.int32, (tile_n, 1), 0)
            _accumulate(jnp.where(idx < n_true, h3, -jnp.inf))

    @pl.when(t == last)
    def _finalize():
        pooled = jnp.max(acc_ref[...], axis=0, keepdims=True)    # (1, 256)
        # Relocated conv3 epilogue: folded bn3 shift + ReLU, once per batch row.
        pool_ref[...] = jnp.maximum(pooled + t3_ref[...], 0.0)


def _head_kernel(pool_ref, wf1_ref, tf1_ref, wf2_ref, tf2_ref, wf3_ref, bf3_ref,
                 out_ref):
    """fc1 + bn_fc1 + relu -> (dropout: eval identity) -> fc2 + bn_fc2 + relu -> fc3."""
    g = pool_ref[...]                                            # (B, 256) f32
    g = jnp.maximum(jnp.dot(g.astype(jnp.bfloat16), wf1_ref[...],
                            preferred_element_type=jnp.float32) + tf1_ref[...],
                    0.0)
    # TODO(synk): nn.Dropout(p=0.4) is identity in eval mode; training-mode RNG mask not implemented.
    g = jnp.maximum(jnp.dot(g.astype(jnp.bfloat16), wf2_ref[...],
                            preferred_element_type=jnp.float32) + tf2_ref[...],
                    0.0)
    out_ref[...] = jnp.dot(g.astype(jnp.bfloat16), wf3_ref[...],
                           preferred_element_type=jnp.float32) + bf3_ref[...]


# --------------------------------------------------------------------------- #
# Wrapper
# --------------------------------------------------------------------------- #
def _round_up(v, m):
    return ((v + m - 1) // m) * m


def _choose_tile(n, max_tile_n):
    """Pick a lane-aligned point-tile size; always pad N to a 128-multiple."""
    assert max_tile_n % 128 == 0, "max_tile_n must be a multiple of 128"
    if n <= max_tile_n:
        tile = _round_up(n, 128)
        return tile, tile
    n_pad = _round_up(n, max_tile_n)
    return max_tile_n, n_pad


def pointnetpp_forward(x_bcn, params, *, max_tile_n=8192):
    """x_bcn: (B, 3, N) float32, matching the PyTorch input layout."""
    B, C, N = x_bcn.shape
    assert C == 3
    tile_n, n_pad = _choose_tile(N, max_tile_n)
    if n_pad != N:
        x_bcn = jnp.pad(x_bcn, ((0, 0), (0, 0), (0, n_pad - N)))
    n_tiles = n_pad // tile_n
    c3 = params["w3"].shape[1]

    def const_spec(a):
        nd = a.ndim
        return pl.BlockSpec(a.shape, lambda b, t, _nd=nd: (0,) * _nd)

    point_kernel = functools.partial(_point_mlp_kernel, tile_n, N, n_pad)
    pooled = pl.pallas_call(
        point_kernel,
        out_shape=jax.ShapeDtypeStruct((B, 1, c3), jnp.float32),
        grid=(B, n_tiles),
        in_specs=[
            # x in native (B, 3, N) layout; squeeze the batch dim in-kernel.
            pl.BlockSpec((None, 3, tile_n), lambda b, t: (b, 0, t)),
            const_spec(params["w1"]), const_spec(params["t1"]),
            const_spec(params["w2"]), const_spec(params["t2"]),
            const_spec(params["w3"]), const_spec(params["t3"]),
        ],
        # Pooled block depends only on b -> resident accumulator across the t axis.
        out_specs=pl.BlockSpec((None, 1, c3), lambda b, t: (b, 0, 0)),
        scratch_shapes=[pltpu.VMEM((8, c3), jnp.float32)],
        compiler_params=pltpu.CompilerParams(
            dimension_semantics=("parallel", "arbitrary"),
            # ~15-25 MiB live at TILE_N=8192; 48 MiB gives headroom on every
            # generation while staying under v7x's 64 MiB physical VMEM.
            vmem_limit_bytes=48 * 1024 * 1024),
    )(x_bcn,
      params["w1"], params["t1"],
      params["w2"], params["t2"],
      params["w3"], params["t3"])

    pooled = pooled.reshape(B, c3)
    num_classes = params["wf3"].shape[1]

    def full_spec(a):
        nd = a.ndim
        return pl.BlockSpec(a.shape, lambda i, _nd=nd: (0,) * _nd)

    head_in = [pooled,
               params["wf1"], params["tf1"],
               params["wf2"], params["tf2"],
               params["wf3"], params["bf3"]]
    out = pl.pallas_call(
        _head_kernel,
        out_shape=jax.ShapeDtypeStruct((B, num_classes), jnp.float32),
        grid=(1,),
        in_specs=[full_spec(a) for a in head_in],
        out_specs=pl.BlockSpec((B, num_classes), lambda i: (0, 0)),
    )(*head_in)
    return out


# --------------------------------------------------------------------------- #
# Parameters (BN eval-mode + bias folded: scale into weight columns, shift kept)
# --------------------------------------------------------------------------- #
def make_params(key, num_classes=10):
    ks = jax.random.split(key, 40)
    it = iter(ks)

    def normal(shape, scale=0.1):
        return (scale * jax.random.normal(next(it), shape)).astype(jnp.float32)

    def uniform_pos(shape):
        return jax.random.uniform(next(it), shape, minval=0.5, maxval=1.5,
                                  dtype=jnp.float32)

    def folded_layer(cin, cout):
        w = normal((cout, cin))          # torch weight layout (cout, cin[,1])
        b = normal((cout,))
        gamma = uniform_pos((cout,))
        beta = normal((cout,))
        run_mean = normal((cout,))
        run_var = uniform_pos((cout,))
        s = gamma / jnp.sqrt(run_var + BN_EPS)
        w_folded = (w.T * s[None, :]).astype(jnp.bfloat16)      # (cin, cout)
        shift = ((b - run_mean) * s + beta).reshape(1, cout).astype(jnp.float32)
        return w_folded, shift

    p = {}
    p["w1"], p["t1"] = folded_layer(3, 64)
    p["w2"], p["t2"] = folded_layer(64, 128)
    p["w3"], p["t3"] = folded_layer(128, 256)
    p["wf1"], p["tf1"] = folded_layer(256, 128)
    p["wf2"], p["tf2"] = folded_layer(128, 64)
    wf3 = normal((num_classes, 64))
    bf3 = normal((num_classes,))
    p["wf3"] = wf3.T.astype(jnp.bfloat16)
    p["bf3"] = bf3.reshape(1, num_classes).astype(jnp.float32)
    return p


# --------------------------------------------------------------------------- #
# Pure-JAX reference (same eval-mode math & bf16 matmul numerics) for validation
# --------------------------------------------------------------------------- #
def reference_forward(x_bcn, p):
    B, C, N = x_bcn.shape
    x = jnp.transpose(x_bcn, (0, 2, 1)).reshape(B * N, C).astype(jnp.bfloat16)
    h = jnp.maximum(jnp.dot(x, p["w1"],
                            preferred_element_type=jnp.float32) + p["t1"], 0.0)
    h = jnp.maximum(jnp.dot(h.astype(jnp.bfloat16), p["w2"],
                            preferred_element_type=jnp.float32) + p["t2"], 0.0)
    h = jnp.maximum(jnp.dot(h.astype(jnp.bfloat16), p["w3"],
                            preferred_element_type=jnp.float32) + p["t3"], 0.0)
    g = jnp.max(h.reshape(B, N, -1), axis=1)
    g = jnp.maximum(jnp.dot(g.astype(jnp.bfloat16), p["wf1"],
                            preferred_element_type=jnp.float32) + p["tf1"], 0.0)
    g = jnp.maximum(jnp.dot(g.astype(jnp.bfloat16), p["wf2"],
                            preferred_element_type=jnp.float32) + p["tf2"], 0.0)
    return jnp.dot(g.astype(jnp.bfloat16), p["wf3"],
                   preferred_element_type=jnp.float32) + p["bf3"]


if __name__ == "__main__":
    key = jax.random.PRNGKey(0)
    kx, kp = jax.random.split(key)
    # Small demo shapes; N=200 exercises both configurations below.
    B, N, num_classes = 2, 200, 10

    x = jax.random.normal(kx, (B, 3, N), dtype=jnp.float32)  # PyTorch layout (B, 3, N)
    params = make_params(kp, num_classes)
    ref = reference_forward(x, params)

    # (1) Multi-tile path: tile 128, n_pad 256 > N -> exercises the pl.when-gated
    #     partial-tile -inf mask AND the cross-tile max accumulation.
    out_small = jax.block_until_ready(
        pointnetpp_forward(x, params, max_tile_n=128))
    # (2) Default large-tile path: single padded tile of 256.
    out_default = jax.block_until_ready(pointnetpp_forward(x, params))

    assert out_small.shape == (B, num_classes)
    assert out_default.shape == (B, num_classes)
    assert jnp.allclose(out_small, ref, atol=1e-2, rtol=1e-2), \
        "kernel/reference mismatch (multi-tile path)"
    assert jnp.allclose(out_default, ref, atol=1e-2, rtol=1e-2), \
        "kernel/reference mismatch (default path)"
    print("KERNEL_OK")
</pallas_src>

<mosaic_0001>
module attributes {stable_mosaic.version = 11 : i64} {
  func.func @_point_mlp_kernel(%arg0: i32, %arg1: i32, %arg2: memref<1x3x128xf32, #tpu.memory_space<vmem>>, %arg3: memref<3x64xbf16, #tpu.memory_space<vmem>>, %arg4: memref<1x64xf32, #tpu.memory_space<vmem>>, %arg5: memref<64x128xbf16, #tpu.memory_space<vmem>>, %arg6: memref<1x128xf32, #tpu.memory_space<vmem>>, %arg7: memref<128x256xbf16, #tpu.memory_space<vmem>>, %arg8: memref<1x256xf32, #tpu.memory_space<vmem>>, %arg9: memref<1x1x256xf32, #tpu.memory_space<vmem>>, %arg10: memref<8x256xf32, #tpu.memory_space<vmem>>) attributes {dimension_semantics = [#tpu.dimension_semantics<parallel>, #tpu.dimension_semantics<arbitrary>], iteration_bounds = array<i64: 2, 2>, scalar_prefetch = 0 : i64, scratch_operands = 1 : i64, tpu.core_type = #tpu.core_type<tc>, window_params = [{transform_indices = @transform_0, window_bounds = array<i64: 1, 3, 128>}, {pipeline_mode = #tpu.pipeline_mode<synchronous>, transform_indices = @transform_1, window_bounds = array<i64: 3, 64>}, {pipeline_mode = #tpu.pipeline_mode<synchronous>, transform_indices = @transform_2, window_bounds = array<i64: 1, 64>}, {pipeline_mode = #tpu.pipeline_mode<synchronous>, transform_indices = @transform_3, window_bounds = array<i64: 64, 128>}, {pipeline_mode = #tpu.pipeline_mode<synchronous>, transform_indices = @transform_4, window_bounds = array<i64: 1, 128>}, {pipeline_mode = #tpu.pipeline_mode<synchronous>, transform_indices = @transform_5, window_bounds = array<i64: 128, 256>}, {pipeline_mode = #tpu.pipeline_mode<synchronous>, transform_indices = @transform_6, window_bounds = array<i64: 1, 256>}, {transform_indices = @transform_7, window_bounds = array<i64: 1, 1, 256>}]} {
    %c0_i32 = arith.constant 0 : i32
    %0 = arith.cmpi eq, %arg1, %c0_i32 : i32
    %1 = arith.extui %0 : i1 to i32
    %c0_i32_0 = arith.constant 0 : i32
    %2 = arith.cmpi ne, %1, %c0_i32_0 : i32
    scf.if %2 {
      %cst_22 = arith.constant 0xFF800000 : f32
      %33 = vector.broadcast %cst_22 : f32 to vector<8x256xf32>
      %c0_23 = arith.constant 0 : index
      %c0_24 = arith.constant 0 : index
      %34 = vector.load %arg10[%c0_23, %c0_24] : memref<8x256xf32, #tpu.memory_space<vmem>>, vector<8x256xf32>
      tpu.vector_store %arg10[%c0_23, %c0_24], %33 {strides = array<i32>} : memref<8x256xf32, #tpu.memory_space<vmem>>, vector<8x256xf32>,
    } else {
    }
    %c0 = arith.constant 0 : index
    %c0_1 = arith.constant 0 : index
    %c0_2 = arith.constant 0 : index
    %3 = vector.load %arg2[%c0, %c0_1, %c0_2] : memref<1x3x128xf32, #tpu.memory_space<vmem>>, vector<1x3x128xf32>
    %4 = vector.shape_cast %3 : vector<1x3x128xf32> to vector<3x128xf32>
    %5 = arith.truncf %4 : vector<3x128xf32> to vector<3x128xbf16>
    %c0_3 = arith.constant 0 : index
    %c0_4 = arith.constant 0 : index
    %6 = vector.load %arg3[%c0_3, %c0_4] : memref<3x64xbf16, #tpu.memory_space<vmem>>, vector<3x64xbf16>
    %cst = arith.constant dense<0.000000e+00> : vector<128x64xf32>
    %7 = tpu.matmul %5, %6, %cst {dimension_numbers = #tpu.dot_dimension_numbers<[0], [0], [1], [1], [0, 1, 1, 1], [], []>} : vector<3x128xbf16>, vector<3x64xbf16>, vector<128x64xf32> -> vector<128x64xf32>
    %c0_5 = arith.constant 0 : index
    %c0_6 = arith.constant 0 : index
    %8 = vector.load %arg4[%c0_5, %c0_6] : memref<1x64xf32, #tpu.memory_space<vmem>>, vector<1x64xf32>
    %9 = vector.broadcast %8 : vector<1x64xf32> to vector<128x64xf32>
    %10 = arith.addf %7, %9 : vector<128x64xf32>
    %cst_7 = arith.constant 0.000000e+00 : f32
    %11 = vector.broadcast %cst_7 : f32 to vector<128x64xf32>
    %12 = arith.maximumf %10, %11 : vector<128x64xf32>
    %13 = arith.truncf %12 : vector<128x64xf32> to vector<128x64xbf16>
    %c0_8 = arith.constant 0 : index
    %c0_9 = arith.constant 0 : index
    %14 = vector.load %arg5[%c0_8, %c0_9] : memref<64x128xbf16, #tpu.memory_space<vmem>>, vector<64x128xbf16>
    %cst_10 = arith.constant dense<0.000000e+00> : vector<128x128xf32>
    %15 = tpu.matmul %13, %14, %cst_10 {dimension_numbers = #tpu.dot_dimension_numbers<[1], [0], [0], [1], [0, 0, 1, 1], [], []>} : vector<128x64xbf16>, vector<64x128xbf16>, vector<128x128xf32> -> vector<128x128xf32>
    %c0_11 = arith.constant 0 : index
    %c0_12 = arith.constant 0 : index
    %16 = vector.load %arg6[%c0_11, %c0_12] : memref<1x128xf32, #tpu.memory_space<vmem>>, vector<1x128xf32>
    %17 = vector.broadcast %16 : vector<1x128xf32> to vector<128x128xf32>
    %18 = arith.addf %15, %17 : vector<128x128xf32>
    %cst_13 = arith.constant 0.000000e+00 : f32
    %19 = vector.broadcast %cst_13 : f32 to vector<128x128xf32>
    %20 = arith.maximumf %18, %19 : vector<128x128xf32>
    %21 = arith.truncf %20 : vector<128x128xf32> to vector<128x128xbf16>
    %c0_14 = arith.constant 0 : index
    %c0_15 = arith.constant 0 : index
    %22 = vector.load %arg7[%c0_14, %c0_15] : memref<128x256xbf16, #tpu.memory_space<vmem>>, vector<128x256xbf16>
    %cst_16 = arith.constant dense<0.000000e+00> : vector<128x256xf32>
    %23 = tpu.matmul %21, %22, %cst_16 {dimension_numbers = #tpu.dot_dimension_numbers<[1], [0], [0], [1], [0, 0, 1, 1], [], []>} : vector<128x128xbf16>, vector<128x256xbf16>, vector<128x256xf32> -> vector<128x256xf32>
    %c1_i32 = arith.constant 1 : i32
    %24 = arith.cmpi ne, %arg1, %c1_i32 : i32
    %25 = arith.extui %24 : i1 to i32
    %c0_i32_17 = arith.constant 0 : i32
    %26 = arith.cmpi ne, %25, %c0_i32_17 : i32
    scf.if %26 {
      %33 = vector.shape_cast %23 : vector<128x256xf32> to vector<16x8x256xf32>
      %c0_22 = arith.constant 0 : index
      %c0_23 = arith.constant 0 : index
      %34 = vector.load %arg10[%c0_22, %c0_23] : memref<8x256xf32, #tpu.memory_space<vmem>>, vector<8x256xf32>
      %cst_24 = arith.constant dense<0xFF800000> : vector<8x256xf32>
      %35 = vector.multi_reduction <maximumf>, %33, %cst_24 [0] : vector<16x8x256xf32> to vector<8x256xf32>
      %36 = arith.maximumf %34, %35 : vector<8x256xf32>
      %c0_25 = arith.constant 0 : index
      %c0_26 = arith.constant 0 : index
      %37 = vector.load %arg10[%c0_25, %c0_26] : memref<8x256xf32, #tpu.memory_space<vmem>>, vector<8x256xf32>
      tpu.vector_store %arg10[%c0_25, %c0_26], %36 {strides = array<i32>} : memref<8x256xf32, #tpu.memory_space<vmem>>, vector<8x256xf32>,
    } else {
    }
    %c1_i32_18 = arith.constant 1 : i32
    %27 = arith.cmpi eq, %arg1, %c1_i32_18 : i32
    %28 = arith.extui %27 : i1 to i32
    %c0_i32_19 = arith.constant 0 : i32
    %29 = arith.cmpi ne, %28, %c0_i32_19 : i32
    scf.if %29 {
      %c128_i32 = arith.constant 128 : i32
      %33 = arith.muli %arg1, %c128_i32 : i32
      %34 = tpu.iota {dimensions = array<i32: 0>} : vector<128x1xi32>
      %35 = vector.broadcast %33 : i32 to vector<128x1xi32>
      %36 = arith.addi %35, %34 : vector<128x1xi32>
      %c200_i32 = arith.constant 200 : i32
      %37 = vector.broadcast %c200_i32 : i32 to vector<128x1xi32>
      %38 = arith.cmpi slt, %36, %37 : vector<128x1xi32>
      %cst_22 = arith.constant 0xFF800000 : f32
      %39 = vector.shape_cast %38 : vector<128x1xi1> to vector<128x1xi1>
      %40 = vector.broadcast %39 : vector<128x1xi1> to vector<128x256xi1>
      %41 = vector.broadcast %cst_22 : f32 to vector<128x256xf32>
      %42 = arith.select %40, %23, %41 : vector<128x256xi1>, vector<128x256xf32>
      %43 = vector.shape_cast %42 : vector<128x256xf32> to vector<16x8x256xf32>
      %c0_23 = arith.constant 0 : index
      %c0_24 = arith.constant 0 : index
      %44 = vector.load %arg10[%c0_23, %c0_24] : memref<8x256xf32, #tpu.memory_space<vmem>>, vector<8x256xf32>
      %cst_25 = arith.constant dense<0xFF800000> : vector<8x256xf32>
      %45 = vector.multi_reduction <maximumf>, %43, %cst_25 [0] : vector<16x8x256xf32> to vector<8x256xf32>
      %46 = arith.maximumf %44, %45 : vector<8x256xf32>
      %c0_26 = arith.constant 0 : index
      %c0_27 = arith.constant 0 : index
      %47 = vector.load %arg10[%c0_26, %c0_27] : memref<8x256xf32, #tpu.memory_space<vmem>>, vector<8x256xf32>
      tpu.vector_store %arg10[%c0_26, %c0_27], %46 {strides = array<i32>} : memref<8x256xf32, #tpu.memory_space<vmem>>, vector<8x256xf32>,
    } else {
    }
    %c1_i32_20 = arith.constant 1 : i32
    %30 = arith.cmpi eq, %arg1, %c1_i32_20 : i32
    %31 = arith.extui %30 : i1 to i32
    %c0_i32_21 = arith.constant 0 : i32
    %32 = arith.cmpi ne, %31, %c0_i32_21 : i32
    scf.if %32 {
      %c0_22 = arith.constant 0 : index
      %c0_23 = arith.constant 0 : index
      %33 = vector.load %arg10[%c0_22, %c0_23] : memref<8x256xf32, #tpu.memory_space<vmem>>, vector<8x256xf32>
      %cst_24 = arith.constant dense<0xFF800000> : vector<256xf32>
      %34 = vector.multi_reduction <maximumf>, %33, %cst_24 [0] : vector<8x256xf32> to vector<256xf32>
      %35 = vector.shape_cast %34 : vector<256xf32> to vector<1x256xf32>
      %c0_25 = arith.constant 0 : index
      %c0_26 = arith.constant 0 : index
      %36 = vector.load %arg8[%c0_25, %c0_26] : memref<1x256xf32, #tpu.memory_space<vmem>>, vector<1x256xf32>
      %37 = arith.addf %35, %36 : vector<1x256xf32>
      %cst_27 = arith.constant 0.000000e+00 : f32
      %38 = vector.broadcast %cst_27 : f32 to vector<1x256xf32>
      %39 = arith.maximumf %37, %38 : vector<1x256xf32>
      %c0_28 = arith.constant 0 : index
      %c0_29 = arith.constant 0 : index
      %c0_30 = arith.constant 0 : index
      %40 = vector.load %arg9[%c0_28, %c0_29, %c0_30] : memref<1x1x256xf32, #tpu.memory_space<vmem>>, vector<1x1x256xf32>
      %41 = vector.shape_cast %40 : vector<1x1x256xf32> to vector<1x256xf32>
      %42 = vector.shape_cast %39 : vector<1x256xf32> to vector<1x1x256xf32>
      tpu.vector_store %arg9[%c0_28, %c0_29, %c0_30], %42 {strides = array<i32>} : memref<1x1x256xf32, #tpu.memory_space<vmem>>, vector<1x1x256xf32>,
    } else {
    }
    return
  }
  func.func @transform_0(%arg0: i32, %arg1: i32) -> (i32, i32, i32) {
    %c0_i32 = arith.constant 0 : i32
    %c0_i32_0 = arith.constant 0 : i32
    return %arg0, %c0_i32, %arg1 : i32, i32, i32
  }
  func.func @transform_1(%arg0: i32, %arg1: i32) -> (i32, i32) {
    %c0_i32 = arith.constant 0 : i32
    %c0_i32_0 = arith.constant 0 : i32
    %c0_i32_1 = arith.constant 0 : i32
    return %c0_i32, %c0_i32_0 : i32, i32
  }
  func.func @transform_2(%arg0: i32, %arg1: i32) -> (i32, i32) {
    %c0_i32 = arith.constant 0 : i32
    %c0_i32_0 = arith.constant 0 : i32
    %c0_i32_1 = arith.constant 0 : i32
    return %c0_i32, %c0_i32_0 : i32, i32
  }
  func.func @transform_3(%arg0: i32, %arg1: i32) -> (i32, i32) {
    %c0_i32 = arith.constant 0 : i32
    %c0_i32_0 = arith.constant 0 : i32
    %c0_i32_1 = arith.constant 0 : i32
    return %c0_i32, %c0_i32_0 : i32, i32
  }
  func.func @transform_4(%arg0: i32, %arg1: i32) -> (i32, i32) {
    %c0_i32 = arith.constant 0 : i32
    %c0_i32_0 = arith.constant 0 : i32
    %c0_i32_1 = arith.constant 0 : i32
    return %c0_i32, %c0_i32_0 : i32, i32
  }
  func.func @transform_5(%arg0: i32, %arg1: i32) -> (i32, i32) {
    %c0_i32 = arith.constant 0 : i32
    %c0_i32_0 = arith.constant 0 : i32
    %c0_i32_1 = arith.constant 0 : i32
    return %c0_i32, %c0_i32_0 : i32, i32
  }
  func.func @transform_6(%arg0: i32, %arg1: i32) -> (i32, i32) {
    %c0_i32 = arith.constant 0 : i32
    %c0_i32_0 = arith.constant 0 : i32
    %c0_i32_1 = arith.constant 0 : i32
    return %c0_i32, %c0_i32_0 : i32, i32
  }
  func.func @transform_7(%arg0: i32, %arg1: i32) -> (i32, i32, i32) {
    %c0_i32 = arith.constant 0 : i32
    %c0_i32_0 = arith.constant 0 : i32
    %c0_i32_1 = arith.constant 0 : i32
    return %arg0, %c0_i32, %c0_i32_0 : i32, i32, i32
  }
}

</mosaic_0001>

<bundles_post_ra>
// kernel: tpu_custom_call.1
= control target key start
LH: loop header
LB: loop body
LE: loop exit
PB: predicated region body
PF: predicated region fallthrough
CT: control target
= control target key end

     0   :  { %12 = vsyncpa [#allocation4], 0  ;;  %s2009_s0 = inlined_call_operand.vmem [shape: f32[2,3,256], index: 0, kind: input, shape index: {}]   ;;  %s2010_s1 = inlined_call_operand.vmem [shape: bf16[3,64], index: 1, kind: input, shape index: {}]   ;;  %s2011_s2 = inlined_call_operand.vmem [shape: f32[1,64], index: 2, kind: input, shape index: {}]   ;;  %s2012_s3 = inlined_call_operand.hbm [shape: bf16[64,128], index: 3, kind: input, shape index: {}]   ;;  %s2013_s4 = inlined_call_operand.vmem [shape: f32[1,128], index: 4, kind: input, shape index: {}]   ;;  %s2014_s5 = inlined_call_operand.hbm [shape: bf16[128,256], index: 5, kind: input, shape index: {}]   ;;  %s2015_s6 = inlined_call_operand.vmem [shape: f32[1,256], index: 6, kind: input, shape index: {}]   ;;  %s2016_s7 = inlined_call_operand.hbm [shape: f32[2,1,256], index: 7, kind: output, shape index: {}]  }
   0x1   :  { %13 = vsyncpa [#allocation7], 0 }
   0x2   :  { %14 = vsyncpa [#allocation5], 0 }
   0x3   :  { %16 = vsyncpa [#allocation5 + $0x1], 0  ;;  %s1589_s24 = smov 0   ;;  %s1591_s25 = smov 0  }
   0x4   :  { %s1593_s26 = smov 0   ;;  %s1595_s27 = smov 0  }
   0x5   :  { %s1597_s28 = smov 0   ;;  %s1599_s29 = smov 0  }
   0x6   :  { %s1601_s30 = smov 0   ;;  %s1603_s8 = smov 0  }
   0x7 LB: > { %2022 = sst [smem:[#allocation12_spill]] %s1531_s29  ;;  %s1140_s9 = sadd.s32 4294967295, %s1539_s8   ;;  %s1539_s8 = sphi %s1603_s8, %s22_s8   ;;  %s1535_s30 = sphi %s1601_s30, %s2035_s30   ;;  %s1531_s29 = sphi %s1599_s29, %s2034_s29   ;;  %s1527_s28 = sphi %s1597_s28, %s2033_s28   ;;  %s1523_s27 = sphi %s1595_s27, %s2032_s27   ;;  %s1519_s26 = sphi %s1593_s26, %s2038_s26   ;;  %s1515_s25 = sphi %s1591_s25, %s2037_s25   ;;  %s1511_s24 = sphi %s1589_s24, %s2036_s24  }
   0x8   : > { %2023 = sst [smem:[#allocation13_spill]] %s1535_s30  ;;  %s1141_s10 = sadd.s32 4294967294, %s1539_s8  }
   0x9   : > { %s31_s11 = sadd.s32 1, %s1531_s29  ;;  %s34_s12 = sadd.s32 1, %s1535_s30 }
   0xa   : > { %p32_p0 = scmp.ge.s32.totalorder %s31_s11, 2  ;;  %s195_s13 = sadd.s32 1, %s1519_s26 }
   0xb   : > { %p205_p1 = scmp.ne.s32.totalorder %s1519_s26, %s1515_s25  ;;  %p206_p2 = scmp.eq.s32.totalorder %s1140_s9, 3 }
   0xc   : > { %s2040_s11 = smov (%p32_p0, %s31_s11), 0  ;;  %s2042_s12 = smov (!%p32_p0, %s34_s12), %s1535_s30 }
   0xd   : > { %2024 = sst [smem:[#allocation14_spill]] %s2040_s11  ;;  %p1639_p3 = por %p206_p2, %p205_p1 }
   0xe   : > { %p211_p4 = scmp.ne.s32.totalorder %s1515_s25, %s1511_s24  ;;  %p36_p5 = scmp.ge.s32.totalorder %s2042_s12, 2 }
   0xf   : > { %p212_p6 = scmp.eq.s32.totalorder %s1141_s10, 3  ;;  %p1142_p7 = scmp.ge.s32.totalorder %s1539_s8, 1 }
  0x10   : > { %p219_p8 = scmp.lt.s32.totalorder %s1539_s8, 5  ;;  %s2044_s12 = smov (%p36_p5, %s2042_s12), 0 }
  0x11   : > { %2026 = sst [smem:[#allocation15_spill]] %s2044_s12  ;;  %p1649_p9 = por %p212_p6, %p211_p4 }
  0x12   : > { %p1653_p10 = pnand %p1142_p7, %p219_p8  ;;  %s192_s17 = ssub.s32 %s1535_s30, %s2044_s12 }
  0x13   : > { %p193_p11 = scmp.eq.s32.totalorder %s192_s17, 0  ;;  %p1661_p13 = scmp.eq.s32.totalorder %s1140_s9, 0 }
  0x14   : > { %p1286_p12 = pneg %p1653_p10  ;;  %s236_s21 = sshll.u32 %s2012_s3, 4  ;;  %s237_s21 = int_to_ptr.hbm [resolvable:$true] %s236_s21 }
  0x15   : > { %s1669_s22 = scalar_select %p193_p11, %s1519_s26, %s195_s13  }
  0x16   : > { %s1541_s23 = smov [#allocation3]   ;;  %p1287_p0 = pnand %p1661_p13, %p1286_p12 }
  0x17   : > { %s238_s10 = sshll.u32 %s1541_s23, 4  ;;  %s1542_s17 = smov 64   ;;  %s239_s10 = int_to_ptr.vmem [resolvable:$true] %s238_s10 }
  0x18   : > { %s1543_s12 = smov 4   ;;  %s253_s30 = sshll.u32 %s2014_s5, 4  ;;  %s254_s30 = int_to_ptr.hbm [resolvable:$true] %s253_s30 }
  0x19   : > { %1289 = dma.hbm_to_vmem [thread:$0]  (!%p1287_p0), %s237_s21, 512, %s239_s10, [#allocation4], %s1542_s17, %s1542_s17, %s1543_s12  }
  0x1a   : > { %s1544_s29 = smov [#allocation6]   ;;  %s1545_s20 = smov 128  }
  0x1b   : > { %s255_s19 = sshll.u32 %s1544_s29, 4  ;;  %s1546_s13 = smov 8   ;;  %s256_s19 = int_to_ptr.vmem [resolvable:$true] %s255_s19 }
  0x1c   : > { %1292 = dma.hbm_to_vmem [thread:$0]  (!%p1287_p0), %s254_s30, 2048, %s256_s19, [#allocation7], %s1545_s20, %s1545_s20, %s1546_s13  }
  0x1d   : > { %285 = sbr.rel (%p1653_p10) target bundleno = 862 (0x35e), region = 48 }
  0x22   : > { %1498 = dma.done.wait (%p1661_p13), [#allocation4], 512  }
  0x23   : > { %1500 = vsyncadd (%p1661_p13), [#allocation4], 4294966784 }
  0x24   : > { %1502 = dma.done.wait (%p1661_p13), [#allocation7], 2048  }
  0x25   : > { %1504 = vsyncadd (%p1661_p13), [#allocation7], 4294965248  ;;  %s323_s29 = sand.u32 1, %s1515_s25   ;;  %p326_p1 = scmp.lt.s32.totalorder %s1527_s28, 1 }
  0x26   : > { %s1690_s30 = sshll.u32 %s323_s29, 1  ;;  %p328_p2 = scmp.lt.s32.totalorder %s1523_s27, 1 }
  0x27   : > { %s327_s11 = scalar_select %p326_p1, %s1527_s28, 1 }
  0x28   : > { %s329_s12 = scalar_select %p328_p2, %s1523_s27, 1 }
  0x29   : > { %s1150_s16 = sshll.u32 %s327_s11, 1  ;;  %s325_s9 = scalar_lea.vmem [#allocation8], %s1690_s30 }
  0x2a   : > { %s331_s21 = sadd.s32 %s1150_s16, %s329_s12  ;;  %p1152_p4 = scmp.ne.s32.totalorder %s1523_s27, 0 }
  0x2b   : > { %s1151_s23 = sshll.u32 %s331_s21, 2 }
  0x2c   : > { %s333_s17 = scalar_lea.vmem %s2009_s0, %s1151_s23  ;;  %338 = sbr.rel (%p1152_p4) target bundleno = 52 (0x34), region = 60 }
  0x31   : > { %v1547_v0 = vmov -inf  }
  0x32   : > { %339 = vst [vmem:[#allocation2] sm:$0xff] %v1547_v0 }
  0x33   : > { %340 = vst [vmem:[#allocation2 + $0x8] sm:$0xff] %v1547_v0 }
  0x34 PF: > { %v341_v1 = vld [vmem:[%s333_s17] sm:$0x7]  ;;  %vm2021_vm0 = vcmask 1040384   ;;  %vm390_vm1 = vcmask 1041408   ;;  %v1548_v4 = vmov 65535   ;;  %vm364_vm2 = vcmask 23552  }
  0x35   : > { %v343_v2 = vld [vmem:[%s2010_s1] sm:$0x3]  ;;  %v342_v3 = vpack.c.bf16 %v341_v1, %v341_v1  ;;  %v391_v5 = vsel %vm2021_vm0, 4294967295, %v1548_v4  ;;  %v1259_v14 = vld [vmem:[#allocation3 + $0x18] sm:$0xff]  ;;  %v1257_v17 = vld [vmem:[#allocation3 + $0x8] sm:$0xff]  ;;  %vm505_vm3 = vcmask 523264  }
  0x36   : > { %v392_v6 = vsel %vm390_vm1, %v391_v5, 0  ;;  %534 = vmatpush.bf16.msra.mxu1 %v1259_v14  ;;  %v1258_v16 = vld [vmem:[#allocation3 + $0x10] sm:$0xff]  ;;  %v1256_v18 = vld [vmem:[#allocation3] sm:$0xff]  ;;  %v1275_v61 = vld [vmem:[#allocation6 + $0x74] sm:$0xf0]  ;;  %p1249_p5 = scmp.eq.s32.totalorder %s1523_s27, 1 }
  0x37   : > { %348 = vxpose.xlu0.c.b16.start.end [1/1] (short) %v342_v3, 128  ;;  %v394_v7 = vand.u32 %v392_v6, %v343_v2  ;;  %v1715_v21 = vld [vmem:[%s2011_s2] ss:$0 sm:$0xff]  ;;  %v1274_v62 = vld [vmem:[#allocation6 + $0x74] sm:$0xf]  ;;  %v1245_v0 = vld [vmem:[#allocation6 + $0x78] sm:$0xf0] }
  0x38   : > { %v1243_v60 = vld [vmem:[#allocation6 + $0x70] sm:$0xf]  ;;  %v1248_v3 = vor.u32 %v1274_v62, %v1245_v0  ;;  %v1235_v5 = vld [vmem:[#allocation6 + $0x60] sm:$0xf]  ;;  %v1273_v6 = vld [vmem:[#allocation6 + $0x64] sm:$0xf0] }
  0x39   : > { %403 = vmatpush.bf16.msra.mxu0 %v394_v7  ;;  %v1244_v63 = vor.u32 %v1275_v61, %v1243_v60  ;;  %v1272_v7 = vld [vmem:[#allocation6 + $0x64] sm:$0xf] }
  0x3a   : > { %535 = vmatpush.bf16.msra.mxu1 %v1258_v16  ;;  %748 = vmatpush.bf16.msra.mxu3 %v1248_v3  ;;  %v1229_v16 = vld [vmem:[#allocation6 + $0x58] sm:$0xf0] }
  0x3b   : > { %699 = vmatpush.bf16.msra.mxu2 %v1244_v63  ;;  %v1744_v63 = vld [vmem:[%s2013_s4] ss:$0 sm:$0xff] }
  0x3e   : > { %536 = vmatpush.bf16.msra.mxu1 %v1257_v17 }
  0x42   : > { %537 = vmatpush.bf16.msra.mxu1 %v1256_v18  ;;  %v1219_v18 = vld [vmem:[#allocation6 + $0x40] sm:$0xf] }
  0xe3   : > { %v356_v8 = vpop.trf.xlu0 }
  0xe4   : > { %1153 = vmatmul.msk.bf16.vlgmr.msra.gmra.mxu0 %vm364_vm2, %v356_v8  ;;  %v1236_v8 = vor.u32 %v1273_v6, %v1235_v5 }
  0xe6   : > { %700 = vmatpush.bf16.msra.mxu2 %v1236_v8 }
  0xf3   : > { %v357_v9 = vpop.trf.xlu0 }
  0xf4   : > { %1154 = vmatmul.msk.bf16.gmra.mxu0 %vm364_vm2, %v357_v9  ;;  %v1237_v9 = vld [vmem:[#allocation6 + $0x68] sm:$0xf0] }
 0x103   : > { %v358_v10 = vpop.trf.xlu0 }
 0x104   : > { %1155 = vmatmul.msk.bf16.gmra.mxu0 %vm364_vm2, %v358_v10  ;;  %v1240_v10 = vor.u32 %v1272_v7, %v1237_v9 }
 0x106   : > { %749 = vmatpush.bf16.msra.mxu3 %v1240_v10 }
 0x113   : > { %v359_v11 = vpop.trf.xlu0 }
 0x114   : > { %1156 = vmatmul.msk.bf16.gmra.mxu0 %vm364_vm2, %v359_v11  ;;  %v1227_v11 = vld [vmem:[#allocation6 + $0x50] sm:$0xf] }
 0x123   : > { %v360_v12 = vpop.trf.xlu0 }
 0x124   : > { %1157 = vmatmul.msk.bf16.gmra.mxu0 %vm364_vm2, %v360_v12  ;;  %v1271_v12 = vld [vmem:[#allocation6 + $0x54] sm:$0xf0] }
 0x133   : > { %v361_v13 = vpop.trf.xlu0 }
 0x134   : > { %1158 = vmatmul.msk.bf16.gmra.mxu0 %vm364_vm2, %v361_v13  ;;  %v1270_v13 = vld [vmem:[#allocation6 + $0x54] sm:$0xf] }
 0x135   : > { %v1232_v17 = vor.u32 %v1270_v13, %v1229_v16 }
 0x137   : > { %750 = vmatpush.bf16.msra.mxu3 %v1232_v17 }
 0x143   : > { %v362_v15 = vpop.trf.xlu0 }
 0x144   : > { %1159 = vmatmul.msk.bf16.gmra.mxu0 %vm364_vm2, %v362_v15  ;;  %v1228_v15 = vor.u32 %v1271_v12, %v1227_v11 }
 0x146   : > { %701 = vmatpush.bf16.msra.mxu2 %v1228_v15 }
 0x153   : > { %v363_v19 = vpop.trf.xlu0 }
 0x154   : > { %1160 = vmatmul.msk.bf16.gmra.mxu0 %vm364_vm2, %v363_v19  ;;  %v1269_v19 = vld [vmem:[#allocation6 + $0x44] sm:$0xf0] }
 0x161   : > { %v405_v20 = vpop.f32.mrf.mxu0 }
 0x162   : > { %v406_v22 = vadd.f32 %v1715_v21, %v405_v20  ;;  %v1268_v20 = vld [vmem:[#allocation6 + $0x44] sm:$0xf] }
 0x164   : > { %v445_v25 = vmax.f32 %v406_v22, 0.0  ;;  %v1221_v22 = vld [vmem:[#allocation6 + $0x48] sm:$0xf0] }
 0x169   : > { %v407_v23 = vpop.f32.mrf.mxu0 }
 0x16a   : > { %v408_v24 = vadd.f32 %v1715_v21, %v407_v23  ;;  %v1220_v23 = vor.u32 %v1269_v19, %v1219_v18 }
 0x16c   : > { %v446_v26 = vmax.f32 %v408_v24, 0.0  ;;  %v1224_v24 = vor.u32 %v1268_v20, %v1221_v22  ;;  %702 = vmatpush.bf16.msra.mxu2 %v1220_v23 }
 0x16e   : > { %v461_v27 = vpack.c.bf16 %v446_v26, %v445_v25  ;;  %751 = vmatpush.bf16.msra.mxu3 %v1224_v24 }
 0x170   : > { %1177 = vmatmul.msk.bf16.vlgmr.msra.gmra.mxu1 %vm505_vm3, %v461_v27 }
 0x171   : > { %v410_v28 = vpop.f32.mrf.mxu0 }
 0x172   : > { %v411_v29 = vadd.f32 %v1715_v21, %v410_v28  ;;  %v1211_v28 = vld [vmem:[#allocation6 + $0x30] sm:$0xf] }
 0x174   : > { %v447_v32 = vmax.f32 %v411_v29, 0.0  ;;  %v1267_v29 = vld [vmem:[#allocation6 + $0x34] sm:$0xf0] }
 0x179   : > { %v412_v30 = vpop.f32.mrf.mxu0 }
 0x17a   : > { %v413_v31 = vadd.f32 %v1715_v21, %v412_v30  ;;  %v1266_v30 = vld [vmem:[#allocation6 + $0x34] sm:$0xf] }
 0x17c   : > { %v448_v33 = vmax.f32 %v413_v31, 0.0  ;;  %v1212_v31 = vor.u32 %v1267_v29, %v1211_v28 }
 0x17e   : > { %v462_v34 = vpack.c.bf16 %v448_v33, %v447_v32  ;;  %v1213_v32 = vld [vmem:[#allocation6 + $0x38] sm:$0xf0]  ;;  %703 = vmatpush.bf16.msra.mxu2 %v1212_v31 }
 0x180   : > { %1178 = vmatmul.msk.bf16.gmra.mxu1 %vm505_vm3, %v462_v34 }
 0x181   : > { %v415_v35 = vpop.f32.mrf.mxu0 }
 0x182   : > { %v416_v36 = vadd.f32 %v1715_v21, %v415_v35  ;;  %v1216_v35 = vor.u32 %v1266_v30, %v1213_v32 }
 0x184   : > { %v449_v39 = vmax.f32 %v416_v36, 0.0  ;;  %752 = vmatpush.bf16.msra.mxu3 %v1216_v35 }
 0x189   : > { %v417_v37 = vpop.f32.mrf.mxu0 }
 0x18a   : > { %v418_v38 = vadd.f32 %v1715_v21, %v417_v37  ;;  %v1203_v37 = vld [vmem:[#allocation6 + $0x20] sm:$0xf] }
 0x18c   : > { %v450_v40 = vmax.f32 %v418_v38, 0.0  ;;  %v1265_v38 = vld [vmem:[#allocation6 + $0x24] sm:$0xf0] }
 0x18e   : > { %v463_v41 = vpack.c.bf16 %v450_v40, %v449_v39  ;;  %v1264_v39 = vld [vmem:[#allocation6 + $0x24] sm:$0xf]  ;;  %v1204_v40 = vor.u32 %v1265_v38, %v1203_v37 }
 0x190   : > { %1179 = vmatmul.msk.bf16.gmra.mxu1 %vm505_vm3, %v463_v41  ;;  %v1205_v41 = vld [vmem:[#allocation6 + $0x28] sm:$0xf0]  ;;  %704 = vmatpush.bf16.msra.mxu2 %v1204_v40 }
 0x191   : > { %v420_v42 = vpop.f32.mrf.mxu0 }
 0x192   : > { %v421_v43 = vadd.f32 %v1715_v21, %v420_v42  ;;  %v1208_v42 = vor.u32 %v1264_v39, %v1205_v41 }
 0x194   : > { %v451_v46 = vmax.f32 %v421_v43, 0.0  ;;  %753 = vmatpush.bf16.msra.mxu3 %v1208_v42 }
 0x199   : > { %v422_v44 = vpop.f32.mrf.mxu0 }
 0x19a   : > { %v423_v45 = vadd.f32 %v1715_v21, %v422_v44  ;;  %v1195_v44 = vld [vmem:[#allocation6 + $0x10] sm:$0xf] }
 0x19c   : > { %v452_v47 = vmax.f32 %v423_v45, 0.0  ;;  %v1263_v45 = vld [vmem:[#allocation6 + $0x14] sm:$0xf0] }
 0x19e   : > { %v464_v48 = vpack.c.bf16 %v452_v47, %v451_v46  ;;  %v1262_v46 = vld [vmem:[#allocation6 + $0x14] sm:$0xf]  ;;  %v1196_v47 = vor.u32 %v1263_v45, %v1195_v44 }
 0x1a0   : > { %1180 = vmatmul.msk.bf16.gmra.mxu1 %vm505_vm3, %v464_v48  ;;  %v1197_v48 = vld [vmem:[#allocation6 + $0x18] sm:$0xf0]  ;;  %705 = vmatpush.bf16.msra.mxu2 %v1196_v47 }
 0x1a1   : > { %v425_v49 = vpop.f32.mrf.mxu0 }
 0x1a2   : > { %v426_v50 = vadd.f32 %v1715_v21, %v425_v49  ;;  %v1200_v49 = vor.u32 %v1262_v46, %v1197_v48 }
 0x1a4   : > { %v453_v53 = vmax.f32 %v426_v50, 0.0  ;;  %754 = vmatpush.bf16.msra.mxu3 %v1200_v49  ;;  %v1187_v50 = vld [vmem:[#allocation6] sm:$0xf] }
 0x1a9   : > { %v427_v51 = vpop.f32.mrf.mxu0 }
 0x1aa   : > { %v428_v52 = vadd.f32 %v1715_v21, %v427_v51  ;;  %v1261_v51 = vld [vmem:[#allocation6 + $0x4] sm:$0xf0] }
 0x1ac   : > { %v454_v54 = vmax.f32 %v428_v52, 0.0  ;;  %v1260_v52 = vld [vmem:[#allocation6 + $0x4] sm:$0xf] }
 0x1ae   : > { %v465_v55 = vpack.c.bf16 %v454_v54, %v453_v53  ;;  %v1188_v53 = vor.u32 %v1261_v51, %v1187_v50  ;;  %v1189_v54 = vld [vmem:[#allocation6 + $0x8] sm:$0xf0] }
 0x1b0   : > { %1181 = vmatmul.msk.bf16.gmra.mxu1 %vm505_vm3, %v465_v55  ;;  %706 = vmatpush.bf16.msra.mxu2 %v1188_v53 }
 0x1b1   : > { %v430_v56 = vpop.f32.mrf.mxu0 }
 0x1b2   : > { %v431_v57 = vadd.f32 %v1715_v21, %v430_v56  ;;  %v1192_v56 = vor.u32 %v1260_v52, %v1189_v54 }
 0x1b4   : > { %v455_v1 = vmax.f32 %v431_v57, 0.0  ;;  %755 = vmatpush.bf16.msra.mxu3 %v1192_v56 }
 0x1b9   : > { %v432_v58 = vpop.f32.mrf.mxu0 }
 0x1ba   : > { %v433_v59 = vadd.f32 %v1715_v21, %v432_v58 }
 0x1bc   : > { %v456_v2 = vmax.f32 %v433_v59, 0.0 }
 0x1be   : > { %v466_v4 = vpack.c.bf16 %v456_v2, %v455_v1 }
 0x1c0   : > { %1182 = vmatmul.msk.bf16.gmra.mxu1 %vm505_vm3, %v466_v4 }
 0x1c1   : > { %v435_v14 = vpop.f32.mrf.mxu0 }
 0x1c2   : > { %v436_v25 = vadd.f32 %v1715_v21, %v435_v14 }
 0x1c4   : > { %v457_v33 = vmax.f32 %v436_v25, 0.0 }
 0x1c9   : > { %v437_v26 = vpop.f32.mrf.mxu0 }
 0x1ca   : > { %v438_v27 = vadd.f32 %v1715_v21, %v437_v26 }
 0x1cc   : > { %v458_v34 = vmax.f32 %v438_v27, 0.0 }
 0x1ce   : > { %v467_v36 = vpack.c.bf16 %v458_v34, %v457_v33 }
 0x1d0   : > { %1183 = vmatmul.msk.bf16.gmra.mxu1 %vm505_vm3, %v467_v36 }
 0x1d1   : > { %v440_v43 = vpop.f32.mrf.mxu0 }
 0x1d2   : > { %v441_v55 = vadd.f32 %v1715_v21, %v440_v43 }
 0x1d4   : > { %v459_v59 = vmax.f32 %v441_v55, 0.0 }
 0x1d9   : > { %v442_v57 = vpop.f32.mrf.mxu0 }
 0x1da   : > { %v443_v58 = vadd.f32 %v1715_v21, %v442_v57 }
 0x1dc   : > { %v460_v60 = vmax.f32 %v443_v58, 0.0 }
 0x1de   : > { %v468_v61 = vpack.c.bf16 %v460_v60, %v459_v59 }
 0x1e0   : > { %1184 = vmatmul.msk.bf16.gmra.mxu1 %vm505_vm3, %v468_v61 }
 0x1ed   : > { %v539_v62 = vpop.f32.mrf.mxu1 }
 0x1ee   : > { %v540_v0 = vadd.f32 %v1744_v63, %v539_v62 }
 0x1f0   : > { %v579_v3 = vmax.f32 %v540_v0, 0.0 }
 0x1f5   : > { %v541_v1 = vpop.f32.mrf.mxu1 }
 0x1f6   : > { %v542_v2 = vadd.f32 %v1744_v63, %v541_v1 }
 0x1f8   : > { %v580_v4 = vmax.f32 %v542_v2, 0.0 }
 0x1fa   : > { %v595_v21 = vpack.c.bf16 %v580_v4, %v579_v3 }
 0x1fc   : > { %707 = vmatmul.bf16.vlgmr.msra.gmra.mxu2 %v595_v21  ;;  %756 = vmatmul.bf16.vlgmr.msra.gmra.mxu3 %v595_v21 }
 0x1fd   : > { %v544_v5 = vpop.f32.mrf.mxu1 }
 0x1fe   : > { %v545_v6 = vadd.f32 %v1744_v63, %v544_v5 }
 0x200   : > { %v581_v9 = vmax.f32 %v545_v6, 0.0 }
 0x205   : > { %v546_v7 = vpop.f32.mrf.mxu1 }
 0x206   : > { %v547_v8 = vadd.f32 %v1744_v63, %v546_v7 }
 0x208   : > { %v582_v10 = vmax.f32 %v547_v8, 0.0 }
 0x20a   : > { %v596_v11 = vpack.c.bf16 %v582_v10, %v581_v9 }
 0x20c   : > { %712 = vmatmul.bf16.gmra.mxu2 %v596_v11  ;;  %761 = vmatmul.bf16.gmra.mxu3 %v596_v11 }
 0x20d   : > { %v549_v12 = vpop.f32.mrf.mxu1 }
 0x20e   : > { %v550_v13 = vadd.f32 %v1744_v63, %v549_v12 }
 0x210   : > { %v583_v16 = vmax.f32 %v550_v13, 0.0 }
 0x215   : > { %v551_v14 = vpop.f32.mrf.mxu1 }
 0x216   : > { %v552_v15 = vadd.f32 %v1744_v63, %v551_v14 }
 0x218   : > { %v584_v17 = vmax.f32 %v552_v15, 0.0 }
 0x21a   : > { %v597_v18 = vpack.c.bf16 %v584_v17, %v583_v16 }
 0x21c   : > { %717 = vmatmul.bf16.gmra.mxu2 %v597_v18  ;;  %766 = vmatmul.bf16.gmra.mxu3 %v597_v18 }
 0x21d   : > { %v554_v19 = vpop.f32.mrf.mxu1 }
 0x21e   : > { %v555_v20 = vadd.f32 %v1744_v63, %v554_v19 }
 0x220   : > { %v585_v24 = vmax.f32 %v555_v20, 0.0 }
 0x225   : > { %v556_v22 = vpop.f32.mrf.mxu1 }
 0x226   : > { %v557_v23 = vadd.f32 %v1744_v63, %v556_v22 }
 0x228   : > { %v586_v25 = vmax.f32 %v557_v23, 0.0 }
 0x22a   : > { %v598_v26 = vpack.c.bf16 %v586_v25, %v585_v24 }
 0x22c   : > { %722 = vmatmul.bf16.gmra.mxu2 %v598_v26  ;;  %771 = vmatmul.bf16.gmra.mxu3 %v598_v26 }
 0x22d   : > { %v559_v27 = vpop.f32.mrf.mxu1 }
 0x22e   : > { %v560_v28 = vadd.f32 %v1744_v63, %v559_v27 }
 0x230   : > { %v587_v31 = vmax.f32 %v560_v28, 0.0 }
 0x235   : > { %v561_v29 = vpop.f32.mrf.mxu1 }
 0x236   : > { %v562_v30 = vadd.f32 %v1744_v63, %v561_v29 }
 0x238   : > { %v588_v32 = vmax.f32 %v562_v30, 0.0 }
 0x23a   : > { %v599_v33 = vpack.c.bf16 %v588_v32, %v587_v31 }
 0x23c   : > { %727 = vmatmul.bf16.gmra.mxu2 %v599_v33  ;;  %776 = vmatmul.bf16.gmra.mxu3 %v599_v33 }
 0x23d   : > { %v564_v34 = vpop.f32.mrf.mxu1 }
 0x23e   : > { %v565_v35 = vadd.f32 %v1744_v63, %v564_v34 }
 0x240   : > { %v589_v38 = vmax.f32 %v565_v35, 0.0 }
 0x245   : > { %v566_v36 = vpop.f32.mrf.mxu1 }
 0x246   : > { %v567_v37 = vadd.f32 %v1744_v63, %v566_v36 }
 0x248   : > { %v590_v39 = vmax.f32 %v567_v37, 0.0 }
 0x24a   : > { %v600_v40 = vpack.c.bf16 %v590_v39, %v589_v38 }
 0x24c   : > { %732 = vmatmul.bf16.gmra.mxu2 %v600_v40  ;;  %781 = vmatmul.bf16.gmra.mxu3 %v600_v40 }
 0x24d   : > { %v569_v41 = vpop.f32.mrf.mxu1 }
 0x24e   : > { %v570_v42 = vadd.f32 %v1744_v63, %v569_v41 }
 0x250   : > { %v591_v45 = vmax.f32 %v570_v42, 0.0 }
 0x255   : > { %v571_v43 = vpop.f32.mrf.mxu1 }
 0x256   : > { %v572_v44 = vadd.f32 %v1744_v63, %v571_v43 }
 0x258   : > { %v592_v46 = vmax.f32 %v572_v44, 0.0 }
 0x25a   : > { %v601_v47 = vpack.c.bf16 %v592_v46, %v591_v45 }
 0x25c   : > { %737 = vmatmul.bf16.gmra.mxu2 %v601_v47  ;;  %786 = vmatmul.bf16.gmra.mxu3 %v601_v47 }
 0x25d   : > { %v574_v48 = vpop.f32.mrf.mxu1 }
 0x25e   : > { %v575_v49 = vadd.f32 %v1744_v63, %v574_v48 }
 0x260   : > { %v593_v52 = vmax.f32 %v575_v49, 0.0 }
 0x265   : > { %v576_v50 = vpop.f32.mrf.mxu1 }
 0x266   : > { %v577_v51 = vadd.f32 %v1744_v63, %v576_v50 }
 0x268   : > { %v594_v53 = vmax.f32 %v577_v51, 0.0 }
 0x26a   : > { %v602_v54 = vpack.c.bf16 %v594_v53, %v593_v52 }
 0x26c   : > { %742 = vmatmul.bf16.gmra.mxu2 %v602_v54  ;;  %791 = vmatmul.bf16.gmra.mxu3 %v602_v54 }
 0x27f   : > { %v1762_v55 = vpop.f32.mrf.mxu2  ;;  %v1764_v56 = vpop.f32.mrf.mxu3 }
 0x287   : > { %v1766_v57 = vpop.f32.mrf.mxu2  ;;  %v1768_v58 = vpop.f32.mrf.mxu3 }
 0x28f   : > { %v1770_v59 = vpop.f32.mrf.mxu2  ;;  %v1772_v60 = vpop.f32.mrf.mxu3 }
 0x297   : > { %v1774_v61 = vpop.f32.mrf.mxu2  ;;  %v1776_v62 = vpop.f32.mrf.mxu3 }
 0x29f   : > { %v1778_v63 = vpop.f32.mrf.mxu2  ;;  %v1780_v0 = vpop.f32.mrf.mxu3 }
 0x2a7   : > { %v1782_v1 = vpop.f32.mrf.mxu2  ;;  %v1784_v2 = vpop.f32.mrf.mxu3 }
 0x2af   : > { %v1786_v3 = vpop.f32.mrf.mxu2  ;;  %v1788_v4 = vpop.f32.mrf.mxu3 }
 0x2b7   : > { %v1790_v21 = vpop.f32.mrf.mxu2  ;;  %v1792_v5 = vpop.f32.mrf.mxu3 }
 0x2bf   : > { %v1794_v6 = vpop.f32.mrf.mxu2  ;;  %v1796_v7 = vpop.f32.mrf.mxu3 }
 0x2c7   : > { %v1798_v8 = vpop.f32.mrf.mxu2  ;;  %v1800_v9 = vpop.f32.mrf.mxu3 }
 0x2cf   : > { %v1802_v10 = vpop.f32.mrf.mxu2  ;;  %v1804_v11 = vpop.f32.mrf.mxu3 }
 0x2d7   : > { %v1806_v12 = vpop.f32.mrf.mxu2  ;;  %v1808_v13 = vpop.f32.mrf.mxu3 }
 0x2df   : > { %v1810_v14 = vpop.f32.mrf.mxu2  ;;  %v1812_v15 = vpop.f32.mrf.mxu3 }
 0x2e7   : > { %v1814_v16 = vpop.f32.mrf.mxu2  ;;  %v1816_v17 = vpop.f32.mrf.mxu3 }
 0x2ef   : > { %v1818_v18 = vpop.f32.mrf.mxu2  ;;  %v1820_v19 = vpop.f32.mrf.mxu3 }
 0x2f3   : > { %800 = sbr.rel (%p1249_p5) target bundleno = 780 (0x30c), region = 64 }
 0x2f7   : > { %v1822_v20 = vpop.f32.mrf.mxu2  ;;  %v1824_v22 = vpop.f32.mrf.mxu3 }
 0x2f8   : > { %v803_v23 = vmax.f32 %v1762_v55, %v1770_v59  ;;  %v804_v24 = vmax.f32 %v1766_v57, %v1774_v61  ;;  %v818_v25 = vmax.f32 %v1764_v56, %v1772_v60  ;;  %v819_v26 = vmax.f32 %v1768_v58, %v1776_v62  ;;  %v801_v51 = vld [vmem:[#allocation2] sm:$0xff]  ;;  %v802_v52 = vld [vmem:[#allocation2 + $0x8] sm:$0xff] }
 0x2fa   : > { %v805_v27 = vmax.f32 %v803_v23, %v1778_v63  ;;  %v806_v28 = vmax.f32 %v804_v24, %v1782_v1  ;;  %v820_v29 = vmax.f32 %v818_v25, %v1780_v0  ;;  %v821_v30 = vmax.f32 %v819_v26, %v1784_v2 }
 0x2fc   : > { %v807_v31 = vmax.f32 %v805_v27, %v1786_v3  ;;  %v808_v32 = vmax.f32 %v806_v28, %v1790_v21  ;;  %v822_v33 = vmax.f32 %v820_v29, %v1788_v4  ;;  %v823_v34 = vmax.f32 %v821_v30, %v1792_v5 }
 0x2fe   : > { %v809_v35 = vmax.f32 %v807_v31, %v1794_v6  ;;  %v810_v36 = vmax.f32 %v808_v32, %v1798_v8  ;;  %v824_v37 = vmax.f32 %v822_v33, %v1796_v7  ;;  %v825_v38 = vmax.f32 %v823_v34, %v1800_v9 }
 0x300   : > { %v811_v39 = vmax.f32 %v809_v35, %v1802_v10  ;;  %v812_v40 = vmax.f32 %v810_v36, %v1806_v12  ;;  %v826_v41 = vmax.f32 %v824_v37, %v1804_v11  ;;  %v827_v42 = vmax.f32 %v825_v38, %v1808_v13 }
 0x302   : > { %v813_v43 = vmax.f32 %v811_v39, %v1810_v14  ;;  %v814_v44 = vmax.f32 %v812_v40, %v1814_v16  ;;  %v828_v45 = vmax.f32 %v826_v41, %v1812_v15  ;;  %v829_v46 = vmax.f32 %v827_v42, %v1816_v17 }
 0x304   : > { %v815_v47 = vmax.f32 %v813_v43, %v1818_v18  ;;  %v816_v48 = vmax.f32 %v814_v44, %v1822_v20  ;;  %v830_v49 = vmax.f32 %v828_v45, %v1820_v19  ;;  %v831_v50 = vmax.f32 %v829_v46, %v1824_v22 }
 0x306   : > { %v817_v53 = vmax.f32 %v815_v47, %v816_v48  ;;  %v832_v54 = vmax.f32 %v830_v49, %v831_v50 }
 0x308   : > { %v833_v23 = vmax.f32 %v801_v51, %v817_v53  ;;  %v834_v24 = vmax.f32 %v802_v52, %v832_v54 }
 0x30a   : > { %835 = vst [vmem:[#allocation2] sm:$0xff] %v833_v23 }
 0x30b   : > { %836 = vst [vmem:[#allocation2 + $0x8] sm:$0xff] %v834_v24 }
 0x30c PF: > { %p1250_p6 = scmp.ne.s32.totalorder %s1523_s27, 1 }
 0x30d   : > { %s1251_s21 = sshll.u32 (!%p1250_p6), %s1523_s27, 7 }
 0x30e   : > { %840 = sbr.rel (%p1250_p6) target bundleno = 847 (0x34f), region = 68 }
 0x313   : > { %v2020_v25 = vlaneseq  ;;  %v859_v29 = vstv %s1251_s21 }
 0x315   : > { %v843_v26 = vshrl.u32 %v2020_v25, 7 }
 0x317   : > { %v844_v27 = vadd.s32 8, %v843_v26  ;;  %v845_v28 = vadd.s32 16, %v843_v26  ;;  %v846_v30 = vadd.s32 24, %v843_v26  ;;  %v847_v31 = vadd.s32 32, %v843_v26 }
 0x318   : > { %v848_v32 = vadd.s32 40, %v843_v26  ;;  %v849_v33 = vadd.s32 48, %v843_v26  ;;  %v850_v34 = vadd.s32 56, %v843_v26  ;;  %v851_v35 = vadd.s32 64, %v843_v26 }
 0x319   : > { %v852_v36 = vadd.s32 72, %v843_v26  ;;  %v853_v37 = vadd.s32 80, %v843_v26  ;;  %v854_v38 = vadd.s32 88, %v843_v26  ;;  %v855_v39 = vadd.s32 96, %v843_v26 }
 0x31a   : > { %v856_v40 = vadd.s32 104, %v843_v26  ;;  %v857_v41 = vadd.s32 112, %v843_v26  ;;  %v858_v42 = vadd.s32 120, %v843_v26  ;;  %v860_v43 = vadd.s32 %v859_v29, %v843_v26 }
 0x31b   : > { %v861_v44 = vadd.s32 %v859_v29, %v844_v27  ;;  %v862_v45 = vadd.s32 %v859_v29, %v845_v28  ;;  %v863_v46 = vadd.s32 %v859_v29, %v846_v30  ;;  %v864_v47 = vadd.s32 %v859_v29, %v847_v31 }
 0x31c   : > { %v865_v48 = vadd.s32 %v859_v29, %v848_v32  ;;  %v866_v49 = vadd.s32 %v859_v29, %v849_v33  ;;  %v867_v50 = vadd.s32 %v859_v29, %v850_v34  ;;  %v868_v51 = vadd.s32 %v859_v29, %v851_v35 }
 0x31d   : > { %v869_v52 = vadd.s32 %v859_v29, %v852_v36  ;;  %v1862_v53 = vadd.s32 %v859_v29, %v853_v37  ;;  %v1864_v54 = vadd.s32 %v859_v29, %v854_v38  ;;  %v1866_v23 = vadd.s32 %v859_v29, %v855_v39 }
 0x31e   : > { %v1868_v24 = vadd.s32 %v859_v29, %v856_v40  ;;  %v1870_v25 = vadd.s32 %v859_v29, %v857_v41  ;;  %v1872_v26 = vadd.s32 %v859_v29, %v858_v42  ;;  %vm876_vm4 = vcmp.lt.s32.totalorder %v860_v43, 200 }
 0x31f   : > { %vm877_vm5 = vcmp.lt.s32.totalorder %v861_v44, 200  ;;  %vm878_vm6 = vcmp.lt.s32.totalorder %v862_v45, 200  ;;  %vm879_vm7 = vcmp.lt.s32.totalorder %v863_v46, 200  ;;  %vm880_vm8 = vcmp.lt.s32.totalorder %v864_v47, 200 }
 0x320   : > { %v924_v27 = vsel %vm876_vm4, %v1762_v55, -inf  ;;  %v928_v28 = vsel %vm878_vm6, %v1770_v59, -inf  ;;  %vm881_vm9 = vcmp.lt.s32.totalorder %v865_v48, 200  ;;  %vm882_vm10 = vcmp.lt.s32.totalorder %v866_v49, 200 }
 0x321   : > { %v926_v30 = vsel %vm877_vm5, %v1766_v57, -inf  ;;  %v930_v29 = vsel %vm879_vm7, %v1774_v61, -inf  ;;  %vm883_vm11 = vcmp.lt.s32.totalorder %v867_v50, 200  ;;  %vm884_vm12 = vcmp.lt.s32.totalorder %v868_v51, 200 }
 0x322   : > { %vm885_vm13 = vcmp.lt.s32.totalorder %v869_v52, 200  ;;  %v932_v31 = vsel %vm880_vm8, %v1778_v63, -inf  ;;  %vm886_vm14 = vcmp.lt.s32.totalorder %v1862_v53, 200  ;;  %vm887_vm15 = vcmp.lt.s32.totalorder %v1864_v54, 200 }
 0x323   : > { %v934_v55 = vsel %vm881_vm9, %v1782_v1, -inf  ;;  %v958_v59 = vmax.f32 %v924_v27, %v928_v28  ;;  %vm888_vm1 = vcmp.lt.s32.totalorder %v1866_v23, 200  ;;  %vm889_vm2 = vcmp.lt.s32.totalorder %v1868_v24, 200  ;;  %v956_v27 = vld [vmem:[#allocation2] sm:$0xff]  ;;  %v957_v24 = vld [vmem:[#allocation2 + $0x8] sm:$0xff] }
 0x324   : > { %v936_v57 = vsel %vm882_vm10, %v1786_v3, -inf  ;;  %v959_v61 = vmax.f32 %v926_v30, %v930_v29  ;;  %v938_v32 = vsel %vm883_vm11, %v1790_v21, -inf  ;;  %v940_v63 = vsel %vm884_vm12, %v1794_v6, -inf }
 0x325   : > { %v960_v33 = vmax.f32 %v958_v59, %v932_v31  ;;  %v925_v34 = vsel %vm876_vm4, %v1764_v56, -inf  ;;  %v927_v35 = vsel %vm877_vm5, %v1768_v58, -inf  ;;  %v929_v36 = vsel %vm878_vm6, %v1772_v60, -inf }
 0x326   : > { %v961_v1 = vmax.f32 %v959_v61, %v934_v55  ;;  %v931_v3 = vsel %vm879_vm7, %v1776_v62, -inf  ;;  %vm890_vm3 = vcmp.lt.s32.totalorder %v1870_v25, 200  ;;  %vm891_vm0 = vcmp.lt.s32.totalorder %v1872_v26, 200 }
 0x327   : > { %v942_v21 = vsel %vm885_vm13, %v1798_v8, -inf  ;;  %v962_v6 = vmax.f32 %v960_v33, %v936_v57  ;;  %v944_v56 = vsel %vm886_vm14, %v1802_v10, -inf  ;;  %v933_v58 = vsel %vm880_vm8, %v1780_v0, -inf }
 0x328   : > { %v963_v37 = vmax.f32 %v961_v1, %v938_v32  ;;  %v935_v60 = vsel %vm881_vm9, %v1784_v2, -inf  ;;  %v946_v62 = vsel %vm887_vm15, %v1806_v12, -inf  ;;  %v973_v39 = vmax.f32 %v925_v34, %v929_v36 }
 0x329   : > { %v964_v38 = vmax.f32 %v962_v6, %v940_v63  ;;  %v974_v40 = vmax.f32 %v927_v35, %v931_v3  ;;  %v948_v8 = vsel %vm888_vm1, %v1810_v14, -inf  ;;  %v937_v10 = vsel %vm882_vm10, %v1788_v4, -inf }
 0x32a   : > { %v965_v41 = vmax.f32 %v963_v37, %v942_v21  ;;  %v939_v0 = vsel %vm883_vm11, %v1792_v5, -inf  ;;  %v950_v2 = vsel %vm889_vm2, %v1814_v16, -inf  ;;  %v975_v12 = vmax.f32 %v973_v39, %v933_v58 }
 0x32b   : > { %v966_v42 = vmax.f32 %v964_v38, %v944_v56  ;;  %v976_v43 = vmax.f32 %v974_v40, %v935_v60  ;;  %v952_v44 = vsel %vm890_vm3, %v1818_v18, -inf  ;;  %v941_v14 = vsel %vm884_vm12, %v1796_v7, -inf }
 0x32c   : > { %v967_v45 = vmax.f32 %v965_v41, %v946_v62  ;;  %v943_v4 = vsel %vm885_vm13, %v1800_v9, -inf  ;;  %v954_v5 = vsel %vm891_vm0, %v1822_v20, -inf  ;;  %v977_v16 = vmax.f32 %v975_v12, %v937_v10 }
 0x32d   : > { %v968_v46 = vmax.f32 %v966_v42, %v948_v8  ;;  %v978_v47 = vmax.f32 %v976_v43, %v939_v0  ;;  %v945_v49 = vsel %vm886_vm14, %v1804_v11, -inf  ;;  %v947_v18 = vsel %vm887_vm15, %v1808_v13, -inf }
 0x32e   : > { %v969_v48 = vmax.f32 %v967_v45, %v950_v2  ;;  %v979_v50 = vmax.f32 %v977_v16, %v941_v14  ;;  %v949_v20 = vsel %vm888_vm1, %v1812_v15, -inf  ;;  %v951_v52 = vsel %vm889_vm2, %v1816_v17, -inf }
 0x32f   : > { %v970_v7 = vmax.f32 %v968_v46, %v952_v44  ;;  %v980_v51 = vmax.f32 %v978_v47, %v943_v4  ;;  %v953_v13 = vsel %vm890_vm3, %v1820_v19, -inf  ;;  %v955_v54 = vsel %vm891_vm0, %v1824_v22, -inf  ;;  %v1006_v22 = vld [vmem:[%s2015_s6] sm:$0x3] }
 0x330   : > { %v971_v9 = vmax.f32 %v969_v48, %v954_v5  ;;  %v981_v28 = vmax.f32 %v979_v50, %v945_v49  ;;  %v1008_v1 = vperm.slane %v1006_v22, 0  ;;  %v1009_v36 = vperm.slane %v1006_v22, 1 }
 0x331   : > { %v982_v53 = vmax.f32 %v980_v51, %v947_v18  ;;  %v2030_v60 = vlaneseq  ;;  %vm2031_vm4 = vcmask 1040384  }
 0x332   : > { %v972_v11 = vmax.f32 %v970_v7, %v971_v9  ;;  %v983_v30 = vmax.f32 %v981_v28, %v949_v20 }
 0x333   : > { %v984_v29 = vmax.f32 %v982_v53, %v951_v52  ;;  %vm1023_vm0 = vcmp.lt.s32.totalorder %v2030_v60, 256 }
 0x334   : > { %v988_v23 = vmax.f32 %v956_v27, %v972_v11  ;;  %v985_v15 = vmax.f32 %v983_v30, %v953_v13 }
 0x335   : > { %v986_v31 = vmax.f32 %v984_v29, %v955_v54 }
 0x336   : > { %990 = vst [vmem:[#allocation2] sm:$0xff] %v988_v23  ;;  %v994_v17 = vrot.slane %v988_v23, 4 }
 0x337   : > { %v987_v55 = vmax.f32 %v985_v15, %v986_v31 }
 0x338   : > { %v995_v59 = vmax.f32 %v988_v23, %v994_v17 }
 0x339   : > { %v989_v57 = vmax.f32 %v957_v24, %v987_v55 }
 0x33a   : > { %v996_v61 = vrot.slane %v995_v59, 2 }
 0x33b   : > { %991 = vst [vmem:[#allocation2 + $0x8] sm:$0xff] %v989_v57  ;;  %v1000_v32 = vrot.slane %v989_v57, 4 }
 0x33c   : > { %v997_v25 = vmax.f32 %v995_v59, %v996_v61 }
 0x33d   : > { %v1001_v19 = vmax.f32 %v989_v57, %v1000_v32 }
 0x33e   : > { %v998_v63 = vrot.slane %v997_v25, 1 }
 0x33f   : > { %v1002_v26 = vrot.slane %v1001_v19, 2 }
 0x340   : > { %v999_v33 = vmax.f32 %v997_v25, %v998_v63 }
 0x341   : > { %v1003_v34 = vmax.f32 %v1001_v19, %v1002_v26 }
 0x342   : > { %v1012_v21 = vadd.f32 %v1008_v1, %v999_v33 }
 0x343   : > { %v1004_v35 = vrot.slane %v1003_v34, 1 }
 0x344   : > { %v1014_v56 = vmax.f32 %v1012_v21, 0.0 }
 0x345   : > { %v1005_v3 = vmax.f32 %v1003_v34, %v1004_v35 }
 0x347   : > { %v1013_v6 = vadd.f32 %v1009_v36, %v1005_v3 }
 0x349   : > { %v1015_v37 = vmax.f32 %v1013_v6, 0.0 }
 0x34b   : > { %v1018_v58 = vrot.slane %v1015_v37, 7 }
 0x34d   : > { %v1019_v62 = vsel %vm2031_vm4, %v1014_v56, %v1018_v58 }
 0x34e   : > { %1025 = vst.msk [vmem:[%s325_s9] sm:$0x3] %vm1023_vm0, %v1019_v62 }
 0x34f PF: > { %s1253_s18 = sshll.u32 %s1527_s28, 1  ;;  %s1039_s20 = sshll.u32 %s325_s9, 4  ;;  %s1040_s20 = int_to_ptr.vmem [resolvable:$true] %s1039_s20 }
 0x350   : > { %s1037_s19 = scalar_lea.hbm %s2016_s7, %s1253_s18  ;;  %s1027_s11 = scalar_lea.sflag [#allocation5], %s323_s29 }
 0x351   : > { %s1041_s13 = sshll.u32 %s1037_s19, 4  ;;  %s1457_s27 = scalar_lea.hbm %s2016_s7, 4  ;;  %s1042_s13 = int_to_ptr.hbm [resolvable:$true] %s1041_s13 }
 0x352   : > { %s1451_s12 = sshra.s32 %s1042_s13, 4  ;;  %s1452_s12 = int_to_ptr.hbm [resolvable:$true] %s1451_s12 }
 0x353   : > { %s1453_s16 = scalar_lea.hbm %s1452_s12, 2  ;;  %p1458_p11 = scmp.lt.s32.totalorder %s1452_s12, %s2016_s7 }
 0x354   : > { %p1454_p7 = scmp.ne.s32.totalorder %s1452_s12, %s1453_s16  ;;  %p1459_p12 = scmp.lt.s32.totalorder %s1457_s27, %s1453_s16 }
 0x356   : > { %p1455_p8 = pnand %p1454_p7, %p1639_p3  ;;  %p1460_p13 = por %p1459_p12, %p1458_p11 }
 0x358   : > { %p1456_p10 = pneg %p1455_p8 }
 0x35a   : > { %p1461_p0 = pnand %p1460_p13, %p1456_p10 }
 0x35c   : > { %1464 = shalt.err (!%p1461_p0)
}
 0x35d   : > { %1284 = dma.vmem_to_hbm [thread:$0]  (%p1639_p3), %s1040_s20, 32, %s1042_s13, %s1027_s11  }
 0x35e PF: > { %p1301_p1 = scmp.ge.s32.totalorder %s1539_s8, 2  ;;  %s1053_s29 = sand.u32 1, %s1511_s24  }
 0x35f   : > { %s1054_s30 = scalar_lea.sflag [#allocation5], %s1053_s29 }
 0x360   : > { %p1294_p2 = pnand %p1301_p1, %p1649_p9 }
 0x362   : > { %p1295_p4 = pneg %p1294_p2 }
 0x364   : > { %1506 = dma.done.wait (%p1295_p4), %s1054_s30, 32  }
 0x365   : > { %1508 = vsyncadd (%p1295_p4), %s1054_s30, 4294967264  ;;  %s22_s8 = sadd.s32 1, %s1539_s8   ;;  %s2032_s27 = sld [smem:[#allocation12_spill]] }
 0x366   : > { %p19_p5 = scmp.ge.s32.totalorder %s22_s8, 6   ;;  %s2033_s28 = sld [smem:[#allocation13_spill]] }
 0x367   : > { %s2034_s29 = sld [smem:[#allocation14_spill]]  ;;  %s2036_s24 = smov %s1515_s25 }
 0x368   : > { %s2035_s30 = sld [smem:[#allocation15_spill]]  ;;  %s2037_s25 = smov %s1519_s26 }
 0x369   : > { %s2038_s26 = smov %s1669_s22  ;;  %21 = sbr.rel (!%p19_p5) target bundleno = 7 (0x7), region = 104 }
 0x36e   :  { %1060 = vsyncpa [#allocation4], 1 }
 0x36f   :  { %1062 = vsyncpa [#allocation4 + $0x1], 1 }
 0x370   :  { %1063 = vsyncpa [#allocation7], 1 }
 0x371   :  { %1064 = vsyncpa [#allocation5], 1 }
 0x372   :  { %1066 = vsyncpa [#allocation5 + $0x1], 1 }

</bundles_post_ra>
